<compile_context>
chip_gen: v6e
topology: v6e:2x2x1
jax: 0.10.0
libtpu: 0.0.40
codegen_flags: <defaults>
</compile_context>

<pallas_src>
import jax
import jax.numpy as jnp
from jax.experimental import pallas as pl
from jax.experimental.pallas import tpu as pltpu


def _copy_kernel(x_ref, o_ref):
    o_ref[...] = x_ref[...]


def _transpose2d_kernel(x_ref, o_ref):
    # x_ref view: (A, L)  ->  o_ref view: (L, A)
    o_ref[...] = x_ref[...].T


def _pick_tile(dim, max_tile=512):
    """Tile size for a transposed dim: must divide `dim` and be a multiple of
    128 (each transposed dim is the lane axis of one block and the sublane axis
    of the other, so 128-multiples satisfy both).  Falls back to the full dim
    when the dim is small or not 128-divisible."""
    if dim <= max_tile or dim % 128 != 0:
        return dim
    for t in range(max_tile, 127, -128):
        if dim % t == 0:
            return t
    return dim


def pallas_transpose(x, axis0, axis1):
    """torch.transpose(x, axis0, axis1) as a single Pallas TPU call."""
    ndim = x.ndim
    a0 = axis0 % ndim
    a1 = axis1 % ndim
    if a0 == a1:
        return x
    a0, a1 = min(a0, a1), max(a0, a1)

    shape = x.shape
    last = ndim - 1
    out_dims = list(shape)
    out_dims[a0], out_dims[a1] = out_dims[a1], out_dims[a0]
    out_shape = jax.ShapeDtypeStruct(tuple(out_dims), x.dtype)

    if a1 <= ndim - 3:
        # ---- pure re-layout: both swapped axes before the last two dims -----
        n_lead = a1 + 1                       # grid over dims 0..a1
        grid = tuple(shape[:n_lead])
        block = (None,) * n_lead + tuple(shape[n_lead:])   # trailing dims full

        def in_map(*g):
            return tuple(g) + (0,) * (ndim - n_lead)

        def out_map(*g):
            g = list(g)
            g[a0], g[a1] = g[a1], g[a0]
            return tuple(g) + (0,) * (ndim - n_lead)

        kernel = _copy_kernel
        in_spec = pl.BlockSpec(block, in_map)
        out_spec = pl.BlockSpec(block, out_map)

    elif a1 == ndim - 2:
        # ---- pure re-layout: a0 swapped with the second-to-last axis --------
        # Keep the full (S, D) plane per step (instead of one (D,) row per
        # step): S x fewer grid iterations, bigger DMAs, same lane density.
        grid_axes = tuple(range(ndim - 2))    # everything before the (S, D) plane
        grid = tuple(shape[i] for i in grid_axes)
        S, D = shape[a1], shape[last]

        in_block = [None] * ndim
        in_block[a1] = S
        in_block[last] = D
        out_block = [None] * ndim
        out_block[a0] = S                     # full output axis a0 (== S)
        out_block[last] = D

        def in_map(*g):
            idx = [0] * ndim
            for gi, ax in zip(g, grid_axes):
                idx[ax] = gi
            return tuple(idx)

        def out_map(*g):
            idx = [0] * ndim
            for gi, ax in zip(g, grid_axes):
                idx[ax] = gi
            # The input-axis-a0 grid coordinate becomes the output's a1 index;
            # output axis a0 is covered in full (block index 0).
            idx[a1] = idx[a0]
            idx[a0] = 0
            return tuple(idx)

        kernel = _copy_kernel
        in_spec = pl.BlockSpec(tuple(in_block), in_map)
        out_spec = pl.BlockSpec(tuple(out_block), out_map)

    elif a0 == ndim - 2:
        # ---- last two dims swapped: tiled in-kernel 2-D transpose -----------
        A, L = shape[a0], shape[last]
        tA, tL = _pick_tile(A), _pick_tile(L)
        lead_axes = tuple(range(ndim - 2))
        n_lead = len(lead_axes)
        grid = tuple(shape[i] for i in lead_axes) + (A // tA, L // tL)

        in_block = [None] * ndim
        in_block[a0] = tA
        in_block[last] = tL
        out_block = [None] * ndim
        out_block[a0] = tL
        out_block[last] = tA

        def in_map(*g):
            idx = [0] * ndim
            for gi, ax in zip(g[:n_lead], lead_axes):
                idx[ax] = gi
            idx[a0] = g[n_lead]
            idx[last] = g[n_lead + 1]
            return tuple(idx)

        def out_map(*g):
            idx = [0] * ndim
            for gi, ax in zip(g[:n_lead], lead_axes):
                idx[ax] = gi
            idx[a0] = g[n_lead + 1]
            idx[last] = g[n_lead]
            return tuple(idx)

        kernel = _transpose2d_kernel
        in_spec = pl.BlockSpec(tuple(in_block), in_map)
        out_spec = pl.BlockSpec(tuple(out_block), out_map)

    else:
        # ---- lane axis swapped with a non-adjacent axis a0 -------------------
        A, L = shape[a0], shape[last]
        grid_axes = tuple(i for i in range(ndim) if i not in (a0, last))
        grid = tuple(shape[i] for i in grid_axes)

        in_block = [None] * ndim
        in_block[a0] = A
        in_block[last] = L
        out_block = [None] * ndim
        out_block[a0] = L
        out_block[last] = A

        def idx_map(*g):
            idx = [0] * ndim
            for gi, ax in zip(g, grid_axes):
                idx[ax] = gi
            return tuple(idx)

        kernel = _transpose2d_kernel
        in_spec = pl.BlockSpec(tuple(in_block), idx_map)
        out_spec = pl.BlockSpec(tuple(out_block), idx_map)

    return pl.pallas_call(
        kernel,
        grid=grid,
        in_specs=[in_spec],
        out_specs=out_spec,
        out_shape=out_shape,
        compiler_params=pltpu.CompilerParams(
            dimension_semantics=("parallel",) * len(grid)),
    )(x)


class Transpose:
    """Mirrors the PyTorch nn.Module: Transpose(axis0, axis1)."""

    def __init__(self, axis0, axis1):
        self.axis0 = axis0
        self.axis1 = axis1

    def __call__(self, x):
        return pallas_transpose(x, self.axis0, self.axis1)


if __name__ == "__main__":
    key = jax.random.PRNGKey(0)
    k1, k2, k3 = jax.random.split(key, 3)

    # 1) (B, S, D): swap seq <-> hidden (adjacent lane-axis transpose).
    x = jax.random.normal(k1, (2, 8, 32), dtype=jnp.float32)
    y = jax.block_until_ready(Transpose(1, 2)(x))
    assert y.shape == (2, 32, 8)
    assert jnp.array_equal(y, jnp.swapaxes(x, 1, 2)), "mismatch Transpose(1, 2)"

    # 2) Negative axes behave like torch.transpose.
    y_neg = jax.block_until_ready(Transpose(-1, -2)(x))
    assert jnp.array_equal(y_neg, y), "mismatch negative axes"

    # 3) (B, S, D): swap batch <-> seq (re-layout with full (S, D) tiles).
    yb = jax.block_until_ready(Transpose(0, 1)(x))
    assert yb.shape == (8, 2, 32)
    assert jnp.array_equal(yb, jnp.swapaxes(x, 0, 1)), "mismatch Transpose(0, 1) 3D"

    # 4) (B, S, D): swap batch <-> hidden (non-adjacent lane swap).
    yc = jax.block_until_ready(Transpose(0, 2)(x))
    assert yc.shape == (32, 8, 2)
    assert jnp.array_equal(yc, jnp.swapaxes(x, 0, 2)), "mismatch Transpose(0, 2)"

    # 5) (B, H, S, Dh): swap batch <-> heads (pure re-layout, full trailing dims).
    x4 = jax.random.normal(k2, (2, 4, 8, 32), dtype=jnp.float32)
    y4 = jax.block_until_ready(Transpose(0, 1)(x4))
    assert y4.shape == (4, 2, 8, 32)
    assert jnp.array_equal(y4, jnp.swapaxes(x4, 0, 1)), "mismatch Transpose(0, 1) 4D"

    # 6) Larger adjacent transpose exercising the 128-multiple tiling path.
    xl = jax.random.normal(k3, (1, 640, 256), dtype=jnp.float32)
    yl = jax.block_until_ready(Transpose(1, 2)(xl))
    assert yl.shape == (1, 256, 640)
    assert jnp.array_equal(yl, jnp.swapaxes(xl, 1, 2)), "mismatch tiled Transpose(1, 2)"

    print("KERNEL_OK")
</pallas_src>

<mosaic_0001>
module attributes {stable_mosaic.version = 11 : i64} {
  func.func @_transpose2d_kernel(%arg0: i32, %arg1: i32, %arg2: i32, %arg3: memref<1x8x32xf32, #tpu.memory_space<vmem>>, %arg4: memref<1x32x8xf32, #tpu.memory_space<vmem>>) attributes {dimension_semantics = [#tpu.dimension_semantics<parallel>, #tpu.dimension_semantics<parallel>, #tpu.dimension_semantics<parallel>], iteration_bounds = array<i64: 2, 1, 1>, scalar_prefetch = 0 : i64, scratch_operands = 0 : i64, tpu.core_type = #tpu.core_type<tc>, window_params = [{transform_indices = @transform_0, window_bounds = array<i64: 1, 8, 32>}, {transform_indices = @transform_1, window_bounds = array<i64: 1, 32, 8>}]} {
    %c0 = arith.constant 0 : index
    %c0_0 = arith.constant 0 : index
    %c0_1 = arith.constant 0 : index
    %0 = vector.load %arg3[%c0, %c0_0, %c0_1] : memref<1x8x32xf32, #tpu.memory_space<vmem>>, vector<1x8x32xf32>
    %1 = vector.shape_cast %0 : vector<1x8x32xf32> to vector<8x32xf32>
    %2 = tpu.transpose %1, [1, 0] : vector<8x32xf32> -> vector<32x8xf32>
    %c0_2 = arith.constant 0 : index
    %c0_3 = arith.constant 0 : index
    %c0_4 = arith.constant 0 : index
    %3 = vector.load %arg4[%c0_2, %c0_3, %c0_4] : memref<1x32x8xf32, #tpu.memory_space<vmem>>, vector<1x32x8xf32>
    %4 = vector.shape_cast %3 : vector<1x32x8xf32> to vector<32x8xf32>
    %5 = vector.shape_cast %2 : vector<32x8xf32> to vector<1x32x8xf32>
    tpu.vector_store %arg4[%c0_2, %c0_3, %c0_4], %5 {strides = array<i32>} : memref<1x32x8xf32, #tpu.memory_space<vmem>>, vector<1x32x8xf32>,
    return
  }
  func.func @transform_0(%arg0: i32, %arg1: i32, %arg2: i32) -> (i32, i32, i32) {
    %c0_i32 = arith.constant 0 : i32
    return %arg0, %arg1, %arg2 : i32, i32, i32
  }
  func.func @transform_1(%arg0: i32, %arg1: i32, %arg2: i32) -> (i32, i32, i32) {
    %c0_i32 = arith.constant 0 : i32
    return %arg0, %arg2, %arg1 : i32, i32, i32
  }
}

</mosaic_0001>

<bundles_post_ra>
// kernel: tpu_custom_call.1
= control target key start
LH: loop header
LB: loop body
LE: loop exit
PB: predicated region body
PF: predicated region fallthrough
CT: control target
= control target key end

     0   :  { %6 = vsyncpa [#allocation3], 0  ;;  %s583_s0 = inlined_call_operand.hbm [shape: f32[2,8,32], index: 0, kind: input, shape index: {}]   ;;  %s584_s1 = inlined_call_operand.vmem [shape: f32[2,32,8], index: 1, kind: output, shape index: {}]  }
   0x1   :  { %8 = vsyncpa [#allocation3 + $0x1], 0  ;;  %s483_s6 = smov 0   ;;  %s485_s7 = smov 0  }
   0x2   :  { %s487_s8 = smov 0   ;;  %s489_s9 = smov 0  }
   0x3   :  { %s491_s10 = smov 0   ;;  %s493_s11 = smov 0  }
   0x4 LB: > { %s323_s12 = sadd.s32 4294967295, %s470_s11   ;;  %s33_s13 = sadd.s32 1, %s466_s10  ;;  %s470_s11 = sphi %s493_s11, %s14_s11   ;;  %s466_s10 = sphi %s491_s10, %s592_s10   ;;  %s462_s9 = sphi %s489_s9, %s591_s9   ;;  %s458_s8 = sphi %s487_s8, %s590_s8   ;;  %s454_s7 = sphi %s485_s7, %s589_s7   ;;  %s450_s6 = sphi %s483_s6, %s588_s6  }
   0x5   : > { %p35_p0 = scmp.ge.s32.totalorder %s33_s13, 2  ;;  %s44_s14 = sadd.s32 1, %s458_s8 }
   0x6   : > { %p51_p1 = scmp.ne.s32.totalorder %s458_s8, %s454_s7  ;;  %p52_p2 = scmp.eq.s32.totalorder %s470_s11, 0 }
   0x7   : > { %s594_s13 = smov (%p35_p0, %s33_s13), 0  ;;  %p57_p4 = scmp.ne.s32.totalorder %s454_s7, %s450_s6 }
   0x8   : > { %p519_p3 = por %p52_p2, %p51_p1  ;;  %s37_s16 = ssub.s32 %s466_s10, %s594_s13 }
   0x9   : > { %p58_p5 = scmp.eq.s32.totalorder %s323_s12, 0  ;;  %p42_p6 = scmp.eq.s32.totalorder %s37_s16, 0 }
   0xa   : > { %p342_p8 = scmp.lt.s32.totalorder %s470_s11, 2  ;;  %s111_s19 = sand.u32 1, %s458_s8  }
   0xb   : > { %p526_p7 = por %p58_p5, %p57_p4  ;;  %s328_s20 = sshll.u32 %s466_s10, 7 }
   0xc   : > { %s532_s18 = scalar_select %p42_p6, %s458_s8, %s44_s14  }
   0xd   : > { %s327_s21 = sshll.u32 %s111_s19, 3  ;;  %s122_s24 = scalar_lea.hbm %s583_s0, %s328_s20 }
   0xe   : > { %s115_s25 = scalar_lea.vmem [#allocation2], %s327_s21  ;;  %p541_p9 = pnand %p342_p8, %p519_p3 }
   0xf   : > { %s124_s26 = sshll.u32 %s115_s25, 4  ;;  %p329_p10 = scmp.ge.s32.totalorder %s470_s11, 1  ;;  %s125_s26 = int_to_ptr.vmem [resolvable:$true] %s124_s26 }
  0x10   : > { %p129_p11 = scmp.lt.s32.totalorder %s470_s11, 3  ;;  %s112_s28 = scalar_lea.sflag [#allocation3], %s111_s19 }
  0x11   : > { %p394_p12 = pneg %p541_p9  ;;  %s405_s29 = scalar_lea.vmem %s125_s26, 128 }
  0x12   : > { %p406_p13 = scmp.ne.s32.totalorder %s125_s26, %s405_s29  ;;  %s472_s30 = smov [#allocation2]  }
  0x13   : > { %s410_s2 = sshll.u32 %s472_s30, 4  ;;  %s411_s2 = int_to_ptr.vmem [resolvable:$false] %s410_s2 }
  0x14   : > { %p408_p0 = pnand %p406_p13, %p394_p12  ;;  %s412_s3 = scalar_lea.vmem %s411_s2, 256 }
  0x15   : > { %p413_p2 = scmp.lt.s32.totalorder %s125_s26, %s411_s2  ;;  %p414_p3 = scmp.lt.s32.totalorder %s412_s3, %s405_s29 }
  0x16   : > { %p409_p1 = pneg %p408_p0 }
  0x17   : > { %p415_p4 = por %p414_p3, %p413_p2 }
  0x19   : > { %p416_p5 = pnand %p415_p4, %p409_p1 }
  0x1b   : > { %419 = shalt.err (!%p416_p5)
}
  0x1c   : > { %341 = dma.hbm_to_vmem [thread:$0]  (!%p541_p9), %s122_s24, 128, %s125_s26, %s112_s28  }
  0x1d   : > { %p130_p6 = pnand %p329_p10, %p129_p11 }
  0x1e   : > { %s135_s4 = sand.u32 (!%p130_p6), 1, %s454_s7  }
  0x1f   : > { %133 = sbr.rel (%p130_p6) target bundleno = 176 (0xb0), region = 24  ;;  %s330_s5 = sshll.u32 (!%p130_p6), %s135_s4, 3 }
  0x20   : > { %s136_s6 = scalar_lea.sflag (!%p130_p6), [#allocation3], %s135_s4  ;;  %s139_s12 = scalar_lea.vmem (!%p130_p6), [#allocation2], %s330_s5 }
  0x24   : > { %445 = dma.done.wait (%p526_p7), %s136_s6, 128  }
  0x25   : > { %447 = vsyncadd (%p526_p7), %s136_s6, 4294967168  ;;  %v178_v0 = vld [vmem:[%s139_s12] sm:$0xff]  ;;  %p166_p8 = scmp.lt.s32.totalorder %s462_s9, 1  ;;  %vm211_vm0 = vcmask 64512  }
  0x26   : > { %179 = vxpose.xlu0.b32.start.end [1/1] (short) (narrow) %v178_v0, 32 }
  0x27   : > { %s596_s9 = smov (!%p166_p8, %s462_s9), 1 }
  0x28   : > { %s335_s14 = sshll.u32 %s596_s9, 5 }
  0x29   : > { %s176_s19 = scalar_lea.vmem %s584_s1, %s335_s14 }
  0xa2   : > { %v195_v1 = vpop.trf.xlu0 }
  0xa3   : > { %212 = vst.msk [vmem:[%s176_s19] sm:$0xff] %vm211_vm0, %v195_v1 }
  0xa6   : > { %v196_v2 = vpop.trf.xlu0 }
  0xa7   : > { %213 = vst.msk [vmem:[%s176_s19 + $0x8] sm:$0xff] %vm211_vm0, %v196_v2 }
  0xaa   : > { %v197_v3 = vpop.trf.xlu0 }
  0xab   : > { %214 = vst.msk [vmem:[%s176_s19 + $0x10] sm:$0xff] %vm211_vm0, %v197_v3 }
  0xae   : > { %v198_v4 = vpop.trf.xlu0 }
  0xaf   : > { %215 = vst.msk [vmem:[%s176_s19 + $0x18] sm:$0xff] %vm211_vm0, %v198_v4 }
  0xb0 PF: > { %s14_s11 = sadd.s32 1, %s470_s11   ;;  %s588_s6 = smov %s454_s7 }
  0xb1   : > { %p11_p7 = scmp.ge.s32.totalorder %s14_s11, 4   ;;  %s589_s7 = smov %s458_s8 }
  0xb2   : > { %s590_s8 = smov %s532_s18  ;;  %s591_s9 = smov %s466_s10 }
  0xb3   : > { %s592_s10 = smov %s594_s13  ;;  %13 = sbr.rel (!%p11_p7) target bundleno = 4 (0x4), region = 64 }
  0xb8   :  { %252 = vsyncpa [#allocation3], 1 }
  0xb9   :  { %254 = vsyncpa [#allocation3 + $0x1], 1 }

</bundles_post_ra>
